<compile_context>
chip_gen: v7x
topology: tpu7x:2x2x1
jax: 0.10.0
libtpu: 0.0.40
codegen_flags: <defaults>
</compile_context>

<pallas_src>
import functools

import jax
import jax.numpy as jnp
from jax.experimental import pallas as pl
from jax.experimental.pallas import tpu as pltpu


def _relu(x):
    return jnp.maximum(x, 0.0)


def _dot(a, b):
    return jnp.dot(a, b, preferred_element_type=jnp.float32)


# ---------------------------------------------------------------------------
# Single fused kernel: metadata MLP + layer-1 expansion + hidden layers + head
# All arrays live whole in VMEM (total footprint well under 1 MB at these
# shapes, so no grid / pipelining is needed on any generation).
# ---------------------------------------------------------------------------
def _fused_kernel(data_ref, wmeta_ref, wmain_ref, o_ref, *,
                  B, S, H, F, n_layers):
    N = B * S
    nm = n_layers - 1          # number of (H, H) mid layers

    # ---- data slab views (samples on lanes) ---------------------------------
    att = data_ref[0:1, :]                       # (1, N)  attenuation, j = b*S+s
    m0 = data_ref[1:2, 0:B]                      # (1, B)  metadata feature 0
    m1 = data_ref[2:3, 0:B]                      # (1, B)  metadata feature 1
    expand = data_ref[8:8 + B, :]                # (B, N)  0/1 S-fold expansion

    # ---- metadata-MLP weight slab views (blocks of F rows) -------------------
    wm1_c0 = wmeta_ref[0:F, 0:1]                 # (F, 1)
    wm1_c1 = wmeta_ref[0:F, 1:2]                 # (F, 1)
    bm1 = wmeta_ref[F:2 * F, 0:1]                # (F, 1)
    wm2_t = wmeta_ref[2 * F:3 * F, 0:F]          # (F, F)
    bm2 = wmeta_ref[3 * F:4 * F, 0:1]            # (F, 1)
    bo = wmeta_ref[4 * F:4 * F + 1, 0:1]         # (1, 1)

    # ---- main-FC weight slab views (blocks of H rows) -------------------------
    w1_att = wmain_ref[0:H, 0:1]                 # (H, 1)  attenuation column of W1
    w1_meta_t = wmain_ref[H:2 * H, 0:F]          # (H, F)  metadata block of W1
    b1 = wmain_ref[(2 + nm) * H:(3 + nm) * H, 0:1]   # (H, 1)

    # ---- metadata MLP (transposed: features on sublanes, batch on lanes) -----
    # Linear(2, F): K=2 is a degenerate MXU shape -> VPU rank-2 update instead.
    h = _relu(wm1_c0 * m0 + wm1_c1 * m1 + bm1)               # (F, B)
    mf_t = _relu(_dot(wm2_t, h) + bm2)                       # (F, B)

    # ---- layer-1 metadata contribution, once per batch row, then expand ------
    mc_t = _dot(w1_meta_t, mf_t) + b1                        # (H, B)
    meta_bcast = _dot(mc_t, expand)                          # (H, N) via MXU

    # ---- layer 1: relu(att * w_att + metadata contribution) ------------------
    x = _relu(w1_att * att + meta_bcast)                     # (H, N)

    # ---- hidden layers 2..n_layers --------------------------------------------
    for i in range(nm):
        w_t = wmain_ref[(2 + i) * H:(3 + i) * H, 0:H]        # (H, H)
        b_c = wmain_ref[(3 + nm + i) * H:(4 + nm + i) * H, 0:1]   # (H, 1)
        x = _relu(_dot(w_t, x) + b_c)
        # TODO(synk): nn.Dropout(0.1) is identity in eval mode; training-time
        # stochastic dropout is not applied here.

    # ---- final Linear(H, 1): lane-dense sublane reduction (no N=1 matmul) -----
    wo = wmain_ref[(3 + 2 * nm) * H:(4 + 2 * nm) * H, 0:1]   # (H, 1)
    o_ref[...] = jnp.sum(x * wo, axis=0, keepdims=True) + bo  # (1, N)


# ---------------------------------------------------------------------------
# Wrapper: pack params into 2 weight slabs + 1 data slab, one pallas_call.
# ---------------------------------------------------------------------------
def _pad_to(a, rows, cols):
    return jnp.pad(a, ((0, rows - a.shape[0]), (0, cols - a.shape[1])))


def _build_weight_slabs(params, n_layers):
    wm1, bm1, wm2, bm2 = params["meta"]
    F = wm1.shape[1]
    fc = params["fc"]
    assert len(fc) == n_layers + 1
    w1, b1 = fc[0]
    H = w1.shape[1]
    wo, bo = fc[-1]

    # metadata-MLP slab: [wm1_t | bm1 | wm2_t | bm2 | bo], each block F rows.
    Wb = max(F, 2)
    meta_blocks = [
        _pad_to(wm1.T, F, Wb),
        _pad_to(bm1.reshape(F, 1), F, Wb),
        _pad_to(wm2.T, F, Wb),
        _pad_to(bm2.reshape(F, 1), F, Wb),
        _pad_to(bo.reshape(1, 1), F, Wb),
    ]
    wmeta = jnp.concatenate(meta_blocks, axis=0)             # (5F, Wb)

    # main-FC slab: [w1_att | w1_meta_t | mid w_t's | b1 | mid b's | wo],
    # each block H rows, stacked along sublanes (row offsets are multiples of H).
    Wa = max(F, H, 1)
    main_blocks = [
        _pad_to(w1[0:1, :].T, H, Wa),                        # (H, 1) att column
        _pad_to(w1[1:, :].T, H, Wa),                         # (H, F) metadata block
    ]
    for w, _ in fc[1:-1]:
        main_blocks.append(_pad_to(w.T, H, Wa))              # (H, H)
    main_blocks.append(_pad_to(b1.reshape(H, 1), H, Wa))
    for _, b in fc[1:-1]:
        main_blocks.append(_pad_to(b.reshape(H, 1), H, Wa))
    main_blocks.append(_pad_to(wo.reshape(H, 1), H, Wa))
    wmain = jnp.concatenate(main_blocks, axis=0)             # ((4+2(nl-1))H, Wa)
    return wmeta, wmain


def simple_fc_forward(attenuation, metadata, params, *, n_layers):
    B, S = attenuation.shape
    N = B * S
    wm1 = params["meta"][0]
    F = wm1.shape[1]
    H = params["fc"][0][0].shape[1]

    wmeta, wmain = _build_weight_slabs(params, n_layers)

    # 0/1 selection matrix repeating each batch column S times (j = b*S + s);
    # a compile-time constant for fixed (B, S), built once here (hoisted out
    # of the kernel) and DMA'd with the data slab.
    expand = (jnp.arange(N)[None, :] // S == jnp.arange(B)[:, None])
    expand = expand.astype(jnp.float32)                      # (B, N)

    # Data slab: rows 0..7 hold att / metadata (sublane-aligned padding),
    # rows 8..8+B hold the expand matrix (offset 8 -> aligned MXU operand).
    top = jnp.zeros((8, N), jnp.float32)
    top = top.at[0, :].set(attenuation.reshape(N).astype(jnp.float32))
    top = top.at[1:3, :B].set(metadata.T.astype(jnp.float32))
    data = jnp.concatenate([top, expand], axis=0)            # (8 + B, N)

    kernel = functools.partial(_fused_kernel, B=B, S=S, H=H, F=F,
                               n_layers=n_layers)
    vmem = lambda: pl.BlockSpec(memory_space=pltpu.MemorySpace.VMEM)
    out_row = pl.pallas_call(
        kernel,
        out_shape=jax.ShapeDtypeStruct((1, N), jnp.float32),
        in_specs=[vmem(), vmem(), vmem()],
        out_specs=vmem(),
    )(data, wmeta, wmain)
    # Module returns the NON-relu'd output reshaped back to (B, S).
    return out_row.reshape(B, S)


# ---------------------------------------------------------------------------
# Deterministic parameter init (synthetic weights, PyTorch-Linear-like ranges)
# Weights stored as (in, out), biases as (1, out).
# ---------------------------------------------------------------------------
def _linear_params(key, in_dim, out_dim):
    kw, kb = jax.random.split(key)
    limit = 1.0 / jnp.sqrt(jnp.float32(in_dim))
    w = jax.random.uniform(kw, (in_dim, out_dim), jnp.float32, -limit, limit)
    b = jax.random.uniform(kb, (1, out_dim), jnp.float32, -limit, limit)
    return w, b


def init_params(key, hidden_size, n_layers, metadata_n_features):
    keys = jax.random.split(key, 2 + n_layers + 1)
    wm1, bm1 = _linear_params(keys[0], 2, metadata_n_features)
    wm2, bm2 = _linear_params(keys[1], metadata_n_features, metadata_n_features)

    fc = []
    in_dim = 1 + metadata_n_features
    for i in range(n_layers):
        fc.append(_linear_params(keys[2 + i], in_dim, hidden_size))
        in_dim = hidden_size
    fc.append(_linear_params(keys[2 + n_layers], hidden_size, 1))
    return {"meta": (wm1, bm1, wm2, bm2), "fc": fc}


# ---------------------------------------------------------------------------
# Pure-JAX reference for correctness checking (mirrors the PyTorch module)
# ---------------------------------------------------------------------------
def reference_forward(attenuation, metadata, params, *, n_layers):
    wm1, bm1, wm2, bm2 = params["meta"]
    B, S = attenuation.shape
    h = _relu(metadata @ wm1 + bm1)
    mf = _relu(h @ wm2 + bm2)
    F = mf.shape[-1]
    combined = jnp.concatenate(
        [attenuation[:, :, None],
         jnp.broadcast_to(mf[:, None, :], (B, S, F))], axis=-1)
    x = combined.reshape(B * S, 1 + F)
    for i in range(n_layers):
        w, b = params["fc"][i]
        x = _relu(x @ w + b)
    wo, bo = params["fc"][-1]
    y = x @ wo + bo
    return y.reshape(B, S)


if __name__ == "__main__":
    hidden_size = 32
    n_layers = 2
    metadata_n_features = 32
    B, S = 16, 64          # batch=16 (as in the source file), seq_len=64

    key = jax.random.PRNGKey(0)
    k_att, k_meta, k_params = jax.random.split(key, 3)
    attenuation = jax.random.normal(k_att, (B, S), jnp.float32)
    metadata = jax.random.normal(k_meta, (B, 2), jnp.float32)
    params = init_params(k_params, hidden_size, n_layers, metadata_n_features)

    fwd = jax.jit(functools.partial(simple_fc_forward, n_layers=n_layers))
    out = fwd(attenuation, metadata, params)
    out = jax.block_until_ready(out)

    ref = reference_forward(attenuation, metadata, params, n_layers=n_layers)
    assert out.shape == (B, S), out.shape
    err = float(jnp.max(jnp.abs(out - ref)))
    assert jnp.allclose(out, ref, atol=5e-4, rtol=5e-4), err

    print("KERNEL_OK")
</pallas_src>

<mosaic_0001>
module attributes {stable_mosaic.version = 11 : i64} {
  func.func @_fused_kernel(%arg0: memref<24x1024xf32, #tpu.memory_space<vmem>>, %arg1: memref<160x32xf32, #tpu.memory_space<vmem>>, %arg2: memref<192x32xf32, #tpu.memory_space<vmem>>, %arg3: memref<1x1024xf32, #tpu.memory_space<vmem>>) attributes {dimension_semantics = [], scalar_prefetch = 0 : i64, scratch_operands = 0 : i64, tpu.core_type = #tpu.core_type<tc>} {
    %c0 = arith.constant 0 : index
    %c0_0 = arith.constant 0 : index
    %0 = vector.load %arg0[%c0, %c0_0] : memref<24x1024xf32, #tpu.memory_space<vmem>>, vector<1x1024xf32>
    %c1 = arith.constant 1 : index
    %c0_1 = arith.constant 0 : index
    %1 = vector.load %arg0[%c1, %c0_1] : memref<24x1024xf32, #tpu.memory_space<vmem>>, vector<1x16xf32>
    %c2 = arith.constant 2 : index
    %c0_2 = arith.constant 0 : index
    %2 = vector.load %arg0[%c2, %c0_2] : memref<24x1024xf32, #tpu.memory_space<vmem>>, vector<1x16xf32>
    %c8 = arith.constant 8 : index
    %c0_3 = arith.constant 0 : index
    %3 = vector.load %arg0[%c8, %c0_3] : memref<24x1024xf32, #tpu.memory_space<vmem>>, vector<16x1024xf32>
    %c0_4 = arith.constant 0 : index
    %c0_5 = arith.constant 0 : index
    %4 = vector.load %arg1[%c0_4, %c0_5] : memref<160x32xf32, #tpu.memory_space<vmem>>, vector<32x1xf32>
    %c0_6 = arith.constant 0 : index
    %c1_7 = arith.constant 1 : index
    %5 = vector.load %arg1[%c0_6, %c1_7] : memref<160x32xf32, #tpu.memory_space<vmem>>, vector<32x1xf32>
    %c32 = arith.constant 32 : index
    %c0_8 = arith.constant 0 : index
    %6 = vector.load %arg1[%c32, %c0_8] : memref<160x32xf32, #tpu.memory_space<vmem>>, vector<32x1xf32>
    %c64 = arith.constant 64 : index
    %c0_9 = arith.constant 0 : index
    %7 = vector.load %arg1[%c64, %c0_9] : memref<160x32xf32, #tpu.memory_space<vmem>>, vector<32x32xf32>
    %c96 = arith.constant 96 : index
    %c0_10 = arith.constant 0 : index
    %8 = vector.load %arg1[%c96, %c0_10] : memref<160x32xf32, #tpu.memory_space<vmem>>, vector<32x1xf32>
    %c128 = arith.constant 128 : index
    %c0_11 = arith.constant 0 : index
    %9 = vector.load %arg1[%c128, %c0_11] : memref<160x32xf32, #tpu.memory_space<vmem>>, vector<1x1xf32>
    %c0_12 = arith.constant 0 : index
    %c0_13 = arith.constant 0 : index
    %10 = vector.load %arg2[%c0_12, %c0_13] : memref<192x32xf32, #tpu.memory_space<vmem>>, vector<32x1xf32>
    %c32_14 = arith.constant 32 : index
    %c0_15 = arith.constant 0 : index
    %11 = vector.load %arg2[%c32_14, %c0_15] : memref<192x32xf32, #tpu.memory_space<vmem>>, vector<32x32xf32>
    %c96_16 = arith.constant 96 : index
    %c0_17 = arith.constant 0 : index
    %12 = vector.load %arg2[%c96_16, %c0_17] : memref<192x32xf32, #tpu.memory_space<vmem>>, vector<32x1xf32>
    %13 = vector.broadcast %4 : vector<32x1xf32> to vector<32x16xf32>
    %14 = vector.broadcast %1 : vector<1x16xf32> to vector<32x16xf32>
    %15 = arith.mulf %13, %14 : vector<32x16xf32>
    %16 = vector.broadcast %5 : vector<32x1xf32> to vector<32x16xf32>
    %17 = vector.broadcast %2 : vector<1x16xf32> to vector<32x16xf32>
    %18 = arith.mulf %16, %17 : vector<32x16xf32>
    %19 = arith.addf %15, %18 : vector<32x16xf32>
    %20 = vector.broadcast %6 : vector<32x1xf32> to vector<32x16xf32>
    %21 = arith.addf %19, %20 : vector<32x16xf32>
    %cst = arith.constant 0.000000e+00 : f32
    %22 = vector.broadcast %cst : f32 to vector<32x16xf32>
    %23 = arith.maximumf %21, %22 : vector<32x16xf32>
    %cst_18 = arith.constant dense<0.000000e+00> : vector<32x16xf32>
    %24 = tpu.matmul %7, %23, %cst_18 {dimension_numbers = #tpu.dot_dimension_numbers<[1], [0], [0], [1], [0, 0, 1, 1], [], []>} : vector<32x32xf32>, vector<32x16xf32>, vector<32x16xf32> -> vector<32x16xf32>
    %25 = vector.broadcast %8 : vector<32x1xf32> to vector<32x16xf32>
    %26 = arith.addf %24, %25 : vector<32x16xf32>
    %cst_19 = arith.constant 0.000000e+00 : f32
    %27 = vector.broadcast %cst_19 : f32 to vector<32x16xf32>
    %28 = arith.maximumf %26, %27 : vector<32x16xf32>
    %cst_20 = arith.constant dense<0.000000e+00> : vector<32x16xf32>
    %29 = tpu.matmul %11, %28, %cst_20 {dimension_numbers = #tpu.dot_dimension_numbers<[1], [0], [0], [1], [0, 0, 1, 1], [], []>} : vector<32x32xf32>, vector<32x16xf32>, vector<32x16xf32> -> vector<32x16xf32>
    %30 = vector.broadcast %12 : vector<32x1xf32> to vector<32x16xf32>
    %31 = arith.addf %29, %30 : vector<32x16xf32>
    %cst_21 = arith.constant dense<0.000000e+00> : vector<32x1024xf32>
    %32 = tpu.matmul %31, %3, %cst_21 {dimension_numbers = #tpu.dot_dimension_numbers<[1], [0], [0], [1], [0, 0, 1, 1], [], []>} : vector<32x16xf32>, vector<16x1024xf32>, vector<32x1024xf32> -> vector<32x1024xf32>
    %33 = vector.broadcast %10 : vector<32x1xf32> to vector<32x1024xf32>
    %34 = vector.broadcast %0 : vector<1x1024xf32> to vector<32x1024xf32>
    %35 = arith.mulf %33, %34 : vector<32x1024xf32>
    %36 = arith.addf %35, %32 : vector<32x1024xf32>
    %cst_22 = arith.constant 0.000000e+00 : f32
    %37 = vector.broadcast %cst_22 : f32 to vector<32x1024xf32>
    %38 = arith.maximumf %36, %37 : vector<32x1024xf32>
    %c64_23 = arith.constant 64 : index
    %c0_24 = arith.constant 0 : index
    %39 = vector.load %arg2[%c64_23, %c0_24] : memref<192x32xf32, #tpu.memory_space<vmem>>, vector<32x32xf32>
    %c128_25 = arith.constant 128 : index
    %c0_26 = arith.constant 0 : index
    %40 = vector.load %arg2[%c128_25, %c0_26] : memref<192x32xf32, #tpu.memory_space<vmem>>, vector<32x1xf32>
    %cst_27 = arith.constant dense<0.000000e+00> : vector<32x1024xf32>
    %41 = tpu.matmul %39, %38, %cst_27 {dimension_numbers = #tpu.dot_dimension_numbers<[1], [0], [0], [1], [0, 0, 1, 1], [], []>} : vector<32x32xf32>, vector<32x1024xf32>, vector<32x1024xf32> -> vector<32x1024xf32>
    %42 = vector.broadcast %40 : vector<32x1xf32> to vector<32x1024xf32>
    %43 = arith.addf %41, %42 : vector<32x1024xf32>
    %cst_28 = arith.constant 0.000000e+00 : f32
    %44 = vector.broadcast %cst_28 : f32 to vector<32x1024xf32>
    %45 = arith.maximumf %43, %44 : vector<32x1024xf32>
    %c160 = arith.constant 160 : index
    %c0_29 = arith.constant 0 : index
    %46 = vector.load %arg2[%c160, %c0_29] : memref<192x32xf32, #tpu.memory_space<vmem>>, vector<32x1xf32>
    %47 = vector.broadcast %46 : vector<32x1xf32> to vector<32x1024xf32>
    %48 = arith.mulf %45, %47 : vector<32x1024xf32>
    %cst_30 = arith.constant dense<0.000000e+00> : vector<1024xf32>
    %49 = vector.multi_reduction <add>, %48, %cst_30 [0] : vector<32x1024xf32> to vector<1024xf32>
    %50 = vector.shape_cast %49 : vector<1024xf32> to vector<1x1024xf32>
    %51 = vector.broadcast %9 : vector<1x1xf32> to vector<1x1024xf32>
    %52 = arith.addf %50, %51 : vector<1x1024xf32>
    %c0_31 = arith.constant 0 : index
    %c0_32 = arith.constant 0 : index
    %53 = vector.load %arg3[%c0_31, %c0_32] : memref<1x1024xf32, #tpu.memory_space<vmem>>, vector<1x1024xf32>
    tpu.vector_store %arg3[%c0_31, %c0_32], %52 {strides = array<i32>} : memref<1x1024xf32, #tpu.memory_space<vmem>>, vector<1x1024xf32>,
    return
  }
}

</mosaic_0001>

<bundles_post_ra>
// kernel: simple_fc_forward.1
= control target key start
LH: loop header
LB: loop body
LE: loop exit
PB: predicated region body
PF: predicated region fallthrough
CT: control target
= control target key end

     0   :  { %v1695_v0 = vmov 1   ;;  %v1696_v4 = vmov 0   ;;  %vm160_vm0 = vcmask 261120   ;;  %vm379_vm1 = vcmask 130048   ;;  %s2175_s1 = inlined_call_operand.vmem [shape: f32[160,32], index: 1, kind: input, shape index: {}]   ;;  %s2176_s2 = inlined_call_operand.vmem [shape: f32[192,32], index: 2, kind: input, shape index: {}]   ;;  %s2177_s0 = inlined_call_operand.vmem [shape: f32[24,1024], index: 0, kind: input, shape index: {}]   ;;  %s2178_s3 = inlined_call_operand.vmem [shape: f32[1,1024], index: 3, kind: output, shape index: {}]  }
   0x1   :  { %1691 = vset.pattern.permute.xlu0 %v1695_v0  ;;  %1689 = vset.pattern.permute.xlu1 %v1695_v0  ;;  %v37_v1 = vld [vmem:[%s2175_s1 + $0x10] sm:$0xff]  ;;  %v35_v2 = vld [vmem:[%s2175_s1] sm:$0xff]  ;;  %v36_v3 = vld [vmem:[%s2175_s1 + $0x8] sm:$0xff] }
   0x2   :  { %97 = vperm.xlu0 %1691, %v37_v1   ;;  %89 = vperm.xlu1 %1689, %v35_v2   ;;  %v38_v5 = vld [vmem:[%s2175_s1 + $0x18] sm:$0xff]  ;;  %v40_v6 = vld [vmem:[%s2175_s1 + $0x28] sm:$0xff]  ;;  %v39_v7 = vld [vmem:[%s2175_s1 + $0x20] sm:$0xff] }
   0x3   :  { %v47_v8 = vld [vmem:[%s2175_s1 + $0x60] sm:$0xff]  ;;  %v41_v9 = vld [vmem:[%s2175_s1 + $0x30] sm:$0xff]  ;;  %v42_v11 = vld [vmem:[%s2175_s1 + $0x38] sm:$0xff] }
   0x4   :  { %v49_v10 = vld [vmem:[%s2175_s1 + $0x70] sm:$0xff]  ;;  %v60_v12 = vld [vmem:[%s2176_s2 + $0x60] sm:$0xff]  ;;  %v48_v13 = vld [vmem:[%s2175_s1 + $0x68] sm:$0xff] }
   0x5   :  { %v62_v14 = vld [vmem:[%s2176_s2 + $0x70] sm:$0xff]  ;;  %v50_v15 = vld [vmem:[%s2175_s1 + $0x78] sm:$0xff]  ;;  %v52_v16 = vld [vmem:[%s2176_s2] sm:$0xff] }
   0x6   :  { %1692 = vset.pattern.permute.xlu0 %v1696_v4  ;;  %93 = vperm.xlu1 %1689, %v36_v3   ;;  %v43_v17 = vld [vmem:[%s2175_s1 + $0x40] sm:$0xff]  ;;  %v61_v18 = vld [vmem:[%s2176_s2 + $0x68] sm:$0xff]  ;;  %v54_v19 = vld [vmem:[%s2176_s2 + $0x10] sm:$0xff] }
   0x7   :  { %66 = vperm.xlu0 %1692, %v35_v2   ;;  %1601 = vmatprep.mubr.msk.f32.mxu0 %vm160_vm0, %v43_v17  ;;  %v63_v20 = vld [vmem:[%s2176_s2 + $0x78] sm:$0xff]  ;;  %v909_v21 = vld [vmem:[%s2176_s2 + $0x80] sm:$0xff]  ;;  %v53_v22 = vld [vmem:[%s2176_s2 + $0x8] sm:$0xff] }
   0x8   :  { %v911_v23 = vld [vmem:[%s2176_s2 + $0x90] sm:$0xff]  ;;  %v55_v24 = vld [vmem:[%s2176_s2 + $0x18] sm:$0xff]  ;;  %v1333_v25 = vld [vmem:[%s2176_s2 + $0xa0] sm:$0xff] }
   0x9   :  { %v910_v26 = vld [vmem:[%s2176_s2 + $0x88] sm:$0xff]  ;;  %v1335_v27 = vld [vmem:[%s2176_s2 + $0xb0] sm:$0xff]  ;;  %v912_v28 = vld [vmem:[%s2176_s2 + $0x98] sm:$0xff] }
   0xa   :  { %1690 = vset.pattern.permute.xlu1 %v1696_v4  ;;  %v51_v29 = vld [vmem:[%s2175_s1 + $0x80] sm:$0x1]  ;;  %v1334_v30 = vld [vmem:[%s2176_s2 + $0xa8] sm:$0xff]  ;;  %v1336_v31 = vld [vmem:[%s2176_s2 + $0xb8] sm:$0xff] }
   0xb   :  { %71 = vperm.xlu0 %1692, %v36_v3   ;;  %81 = vperm.xlu1 %1690, %v38_v5   ;;  %v17_v38 = vld [vmem:[%s2177_s0 + $0x1] ss:$0 sm:$0xff]  ;;  %v18_v40 = vld [vmem:[%s2177_s0 + $0x2] ss:$0 sm:$0xff] }
   0xf   :  { %76 = vperm.xlu0 %1692, %v37_v1   ;;  %1693 = vset.pattern.permute.xlu1 %v1695_v0 }
  0x10   :  { %101 = vperm.xlu1 %1693, %v38_v5   ;;  %v45_v5 = vld [vmem:[%s2175_s1 + $0x50] sm:$0xff] }
  0x13   :  { %119 = vperm.xlu0 %1692, %v40_v6   ;;  %v46_v6 = vld [vmem:[%s2175_s1 + $0x58] sm:$0xff] }
  0x14   :  { %1694 = vset.pattern.permute.xlu1 %v1696_v4  ;;  %v44_v4 = vld [vmem:[%s2175_s1 + $0x48] sm:$0xff] }
  0x15   :  { %114 = vperm.xlu1 %1694, %v39_v7   ;;  %v56_v7 = vld [vmem:[%s2176_s2 + $0x20] sm:$0xff] }
  0x16   :  { %1615 = vmatprep.mubr.msk.f32.mxu1 %vm160_vm0, %v56_v7 }
  0x17   :  { %142 = vperm.xlu0 %1692, %v47_v8  }
  0x19   :  { %124 = vperm.xlu1 %1694, %v41_v9  }
  0x1b   :  { %152 = vperm.xlu0 %1692, %v49_v10  }
  0x1d   :  { %129 = vperm.xlu1 %1694, %v42_v11  }
  0x1f   :  { %264 = vperm.xlu0 %1692, %v60_v12  }
  0x21   :  { %147 = vperm.xlu1 %1694, %v48_v13  }
  0x23   :  { %274 = vperm.xlu0 %1692, %v62_v14  }
  0x25   :  { %157 = vperm.xlu1 %1694, %v50_v15  }
  0x27   :  { %750 = vperm.xlu0 %1692, %v52_v16  }
  0x29   :  { %269 = vperm.xlu1 %1694, %v61_v18  }
  0x2b   :  { %760 = vperm.xlu0 %1692, %v54_v19  }
  0x2d   :  { %279 = vperm.xlu1 %1694, %v63_v20  }
  0x2f   :  { %915 = vperm.xlu0 %1692, %v909_v21  }
  0x31   :  { %755 = vperm.xlu1 %1694, %v53_v22  }
  0x33   :  { %925 = vperm.xlu0 %1692, %v911_v23  }
  0x35   :  { %765 = vperm.xlu1 %1694, %v55_v24  }
  0x37   :  { %1339 = vperm.xlu0 %1692, %v1333_v25  }
  0x39   :  { %920 = vperm.xlu1 %1694, %v910_v26   ;;  %v57_v26 = vld [vmem:[%s2176_s2 + $0x28] sm:$0xff] }
  0x3b   :  { %1349 = vperm.xlu0 %1692, %v1335_v27   ;;  %v58_v27 = vld [vmem:[%s2176_s2 + $0x30] sm:$0xff] }
  0x3d   :  { %930 = vperm.xlu1 %1694, %v912_v28   ;;  %v59_v28 = vld [vmem:[%s2176_s2 + $0x38] sm:$0xff] }
  0x3f   :  { %1463 = vperm.xlu0 %1692, %v51_v29   ;;  %v20_v29 = vld [vmem:[%s2177_s0 + $0x48] sm:$0xff] }
  0x41   :  { %1344 = vperm.xlu1 %1694, %v1334_v30   ;;  %v28_v30 = vld [vmem:[%s2177_s0 + $0x88] sm:$0xff] }
  0x45   :  { %1354 = vperm.xlu1 %1694, %v1336_v31   ;;  %v22_v31 = vld [vmem:[%s2177_s0 + $0x58] sm:$0xff] }
  0x81   :  { %v90_v32 = vpop.permute.xlu1 %89  ;;  %v98_v33 = vpop.permute.xlu0 %97 }
  0x82   :  { %v104_v45 = vmul.f32 %v90_v32, %v18_v40  ;;  %v106_v53 = vmul.f32 %v98_v33, %v18_v40  ;;  %v1637_v32 = vpack.c.bf16 %v28_v30, %v20_v29  ;;  %v30_v33 = vld [vmem:[%s2177_s0 + $0x98] sm:$0xff] }
  0x85   :  { %v94_v34 = vpop.permute.xlu1 %93 }
  0x86   :  { %v67_v35 = vpop.permute.xlu0 %66  ;;  %v105_v42 = vmul.f32 %v94_v34, %v18_v40  ;;  %v19_v34 = vld [vmem:[%s2177_s0 + $0x40] sm:$0xff] }
  0x87   :  { %v84_v43 = vmul.f32 %v67_v35, %v17_v38  ;;  %v27_v35 = vld [vmem:[%s2177_s0 + $0x80] sm:$0xff] }
  0x89   :  { %v108_v49 = vadd.f32 %v104_v45, %v84_v43  ;;  %v32_v43 = vld [vmem:[%s2177_s0 + $0xa8] sm:$0xff] }
  0x8a   :  { %v72_v36 = vpop.permute.xlu0 %71  ;;  %v82_v37 = vpop.permute.xlu1 %81 }
  0x8b   :  { %v85_v39 = vmul.f32 %v72_v36, %v17_v38  ;;  %v87_v58 = vmul.f32 %v82_v37, %v17_v38  ;;  %v1641_v36 = vpack.c.bf16 %v30_v33, %v22_v31  ;;  %v1639_v37 = vpack.c.bf16 %v27_v35, %v19_v34 }
  0x8d   :  { %v109_v46 = vadd.f32 %v105_v42, %v85_v39  ;;  %v29_v39 = vld [vmem:[%s2177_s0 + $0x90] sm:$0xff]  ;;  %v24_v42 = vld [vmem:[%s2177_s0 + $0x68] sm:$0xff] }
  0x8e   :  { %v77_v41 = vpop.permute.xlu0 %76  ;;  %v1645_v45 = vpack.c.bf16 %v32_v43, %v24_v42 }
  0x8f   :  { %v102_v44 = vpop.permute.xlu1 %101  ;;  %v86_v51 = vmul.f32 %v77_v41, %v17_v38  ;;  %v21_v38 = vld [vmem:[%s2177_s0 + $0x50] sm:$0xff]  ;;  %v1697_v41 = vmov 0.0  }
  0x90   :  { %v107_v54 = vmul.f32 %v102_v44, %v18_v40  ;;  %v1643_v40 = vpack.c.bf16 %v29_v39, %v21_v38  ;;  %v26_v44 = vld [vmem:[%s2177_s0 + $0x78] sm:$0xff] }
  0x91   :  { %v110_v59 = vadd.f32 %v106_v53, %v86_v51  ;;  %v33_v51 = vld [vmem:[%s2177_s0 + $0xb0] sm:$0xff] }
  0x92   :  { %v120_v47 = vpop.permute.xlu0 %119  ;;  %v111_v62 = vadd.f32 %v107_v54, %v87_v58 }
  0x93   :  { %v133_v48 = vadd.f32 %v120_v47, %v109_v46  ;;  %v34_v46 = vld [vmem:[%s2177_s0 + $0xb8] sm:$0xff] }
  0x94   :  { %v115_v50 = vpop.permute.xlu1 %114  ;;  %v1649_v47 = vpack.c.bf16 %v34_v46, %v26_v44 }
  0x95   :  { %v132_v52 = vadd.f32 %v115_v50, %v108_v49  ;;  %v137_v55 = vmax.f32 %v133_v48, 0.0  ;;  %v23_v48 = vld [vmem:[%s2177_s0 + $0x60] sm:$0xff]  ;;  %v25_v50 = vld [vmem:[%s2177_s0 + $0x70] sm:$0xff] }
  0x96   :  { %v143_v9 = vpop.permute.xlu0 %142  ;;  %v31_v49 = vld [vmem:[%s2177_s0 + $0xa0] sm:$0xff] }
  0x97   :  { %v136_v56 = vmax.f32 %v132_v52, 0.0 }
  0x98   :  { %v125_v57 = vpop.permute.xlu1 %124 }
  0x99   :  { %v1621_v60 = vpack.c.bf16 %v137_v55, %v136_v56  ;;  %v134_v61 = vadd.f32 %v125_v57, %v110_v59  ;;  %v1647_v56 = vpack.c.bf16 %v31_v49, %v23_v48  ;;  %v1651_v57 = vpack.c.bf16 %v33_v51, %v25_v50 }
  0x9a   :  { %v153_v18 = vpop.permute.xlu0 %152 }
  0x9b   :  { %1622 = vmatprep.subr.bf16.mxu0 %v1621_v60  ;;  %v138_v1 = vmax.f32 %v134_v61, 0.0 }
  0x9c   :  { %v130_v63 = vpop.permute.xlu1 %129  ;;  %1624 = vmatpush3.bf16.msra.mxu0 %v1621_v60 }
  0x9d   :  { %v135_v0 = vadd.f32 %v130_v63, %v111_v62 }
  0x9e   :  { %v265_v53 = vpop.permute.xlu0 %264 }
  0x9f   :  { %v139_v2 = vmax.f32 %v135_v0, 0.0 }
  0xa0   :  { %v148_v8 = vpop.permute.xlu1 %147 }
  0xa1   :  { %v1625_v3 = vpack.c.bf16 %v139_v2, %v138_v1  ;;  %v769_v2 = vlaneseq }
  0xa2   :  { %v275_v62 = vpop.permute.xlu0 %274 }
  0xa3   :  { %1626 = vmatprep.subr.bf16.mxu0 %v1625_v3 }
  0xa4   :  { %1628 = vmatpush3.bf16.msra.mxu0 %v1625_v3  ;;  %v158_v15 = vpop.permute.xlu1 %157  ;;  %v1926_v3 = vshrl.u32 %v769_v2, 7 }
  0xa5   :  { %1638 = vmatprep.subr.bf16.mxu0 %v1637_v32 }
  0xa6   :  { %v771_v7 = vsub.s32 0, %v1926_v3  ;;  %v799_v49 = vsub.s32 7, %v1926_v3 }
  0xa7   :  { %1602 = vmatmul.mubr.msk.f32.vlgmr.msra.gmra.mrb[0].mxu0 %vm160_vm0, %v44_v4  ;;  %v14_v4 = vld [vmem:[%s2177_s0] ss:$8 sm:$0xf] }
  0xa8   :  { %1604 = vmatprep.mubr.msk.f32.mxu0 %vm160_vm0, %v45_v5  ;;  %1640 = vmatpush1.bf16.msra.mxu0 %v1639_v37  ;;  %v270_v59 = vpop.permute.xlu1 %269  ;;  %v15_v5 = vld [vmem:[%s2177_s0] ss:$8 sm:$0xf0] }
  0xa9   :  { %1646 = vmatprep.subr.bf16.mxu0 %v1645_v45 }
  0xab   :  { %1605 = vmatmul.mubr.msk.f32.gmra.mrb[2].mxu0 %vm160_vm0, %v46_v6  ;;  %v1934_v6 = vor.u32 %v15_v5, %v14_v4 }
  0xac   :  { %456 = vmatprep.mubr.f32.mxu0 %v1697_v41  ;;  %v280_v0 = vpop.permute.xlu1 %279 }
 0x17a   :  { %v1603_v10 = vpop.f32.mrb[0].mxu0 }
 0x17b   :  { %v245_v11 = vadd.f32 %v1603_v10, %v148_v8  ;;  %v239_v12 = vpop.f32.mrb[1].mxu0  ;;  %v779_v8 = vsub.s32 2, %v1926_v3  ;;  %v783_v10 = vsub.s32 3, %v1926_v3 }
 0x17c   :  { %v240_v13 = vadd.f32 %v239_v12, %v143_v9  ;;  %v775_v9 = vsub.s32 1, %v1926_v3  ;;  %v772_v12 = vrot.slane %v1934_v6, %v771_v7 }
 0x17d   :  { %v259_v14 = vmax.f32 %v245_v11, 0.0  ;;  %v1940_v11 = vpop.permute.xlu0 %750 }
 0x17e   :  { %v258_v16 = vmax.f32 %v240_v13, 0.0  ;;  %v1606_v17 = vpop.f32.mrb[2].mxu0  ;;  %v780_v13 = vrot.slane %v1934_v6, %v779_v8 }
 0x17f   :  { %v255_v19 = vadd.f32 %v1606_v17, %v158_v15  ;;  %v249_v20 = vpop.f32.mrb[3].mxu0  ;;  %v1946_v15 = vrot.slane %v1934_v6, %v783_v10 }
 0x180   :  { %v250_v21 = vadd.f32 %v249_v20, %v153_v18  ;;  %v1629_v22 = vpack.c.bf16 %v259_v14, %v258_v16  ;;  %v776_v14 = vrot.slane %v1934_v6, %v775_v9  ;;  %v1948_v16 = vpop.permute.xlu1 %755  ;;  %v811_v20 = vmul.f32 %v780_v13, %v1940_v11 }
 0x181   :  { %v261_v23 = vmax.f32 %v255_v19, 0.0  ;;  %v809_v19 = vmul.f32 %v772_v12, %v1940_v11  ;;  %v817_v31 = vmul.f32 %v772_v12, %v1948_v16  ;;  %v819_v32 = vmul.f32 %v780_v13, %v1948_v16 }
 0x182   :  { %v260_v24 = vmax.f32 %v250_v21, 0.0  ;;  %1630 = vmatprep.subr.bf16.mxu1 %v1629_v22  ;;  %v818_v37 = vmul.f32 %v776_v14, %v1948_v16  ;;  %v820_v38 = vmul.f32 %v1946_v15, %v1948_v16 }
 0x183   :  { %1632 = vmatpush3.bf16.msra.mxu1 %v1629_v22 }
 0x184   :  { %v1633_v25 = vpack.c.bf16 %v261_v23, %v260_v24  ;;  %v787_v23 = vsub.s32 4, %v1926_v3  ;;  %v795_v24 = vsub.s32 6, %v1926_v3  ;;  %v1973_v50 = vpop.permute.xlu1 %765 }
 0x185   :  { %v833_v8 = vmul.f32 %v772_v12, %v1973_v50 }
 0x186   :  { %1634 = vmatprep.subr.bf16.mxu1 %v1633_v25  ;;  %v1966_v44 = vrot.slane %v1934_v6, %v787_v23  ;;  %v1969_v45 = vrot.slane %v1934_v6, %v795_v24  ;;  %v836_v23 = vmul.f32 %v1946_v15, %v1973_v50 }
 0x187   :  { %1636 = vmatpush3.bf16.msra.mxu1 %v1633_v25  ;;  %v810_v25 = vmul.f32 %v776_v14, %v1940_v11 }
 0x188   :  { %1642 = vmatprep.subr.bf16.mxu1 %v1641_v36 }
 0x18a   :  { %1616 = vmatmul.mubr.msk.f32.vlgmr.msra.gmra.mrb[0].mxu1 %vm160_vm0, %v57_v26  ;;  %v812_v26 = vmul.f32 %v1946_v15, %v1940_v11 }
 0x18b   :  { %1618 = vmatprep.mubr.msk.f32.mxu1 %vm160_vm0, %v58_v27  ;;  %1644 = vmatpush1.bf16.msra.mxu1 %v1643_v40  ;;  %v791_v27 = vsub.s32 5, %v1926_v3 }
 0x18c   :  { %1650 = vmatprep.subr.bf16.mxu1 %v1649_v47 }
 0x18e   :  { %1619 = vmatmul.mubr.msk.f32.gmra.mrb[2].mxu1 %vm160_vm0, %v59_v28  ;;  %v1958_v28 = vpop.permute.xlu0 %760 }
 0x18f   :  { %545 = vmatprep.mubr.f32.mxu1 %v1697_v41  ;;  %v825_v48 = vmul.f32 %v772_v12, %v1958_v28  ;;  %v828_v7 = vmul.f32 %v1946_v15, %v1958_v28  ;;  %v1985_v12 = vrot.slane %v1934_v6, %v791_v27 }
 0x25d   :  { %v1617_v52 = vpop.f32.mrb[0].mxu1 }
 0x25e   :  { %v360_v54 = vpop.f32.mrb[1].mxu1  ;;  %v366_v61 = vadd.f32 %v1617_v52, %v270_v59 }
 0x25f   :  { %v361_v55 = vadd.f32 %v360_v54, %v265_v53 }
 0x261   :  { %v1620_v58 = vpop.f32.mrb[2].mxu1  ;;  %1545 = vmatmul.mubr.msk.f32.vlgmr.msra.gmra.mrb[4].mxu0 %vm379_vm1, %v361_v55  ;;  %1549 = vmatmul.mubr.msk.f32.vlgmr.msra.gmra.mrb[4].mxu1 %vm379_vm1, %v361_v55 }
 0x262   :  { %v370_v60 = vpop.f32.mrb[3].mxu1  ;;  %462 = vmatprep.mubr.f32.mxu0 %v1697_v41  ;;  %551 = vmatprep.mubr.f32.mxu1 %v1697_v41  ;;  %v376_v1 = vadd.f32 %v1620_v58, %v280_v0 }
 0x263   :  { %1648 = vmatpush1.bf16.msra.mxu0 %v1647_v56  ;;  %1652 = vmatpush1.bf16.msra.mxu1 %v1651_v57  ;;  %v371_v63 = vadd.f32 %v370_v60, %v275_v62 }
 0x265   :  { %1546 = vmatmul.mubr.msk.f32.gmra.mrb[6].mxu0 %vm379_vm1, %v366_v61  ;;  %1550 = vmatmul.mubr.msk.f32.gmra.mrb[6].mxu1 %vm379_vm1, %v366_v61 }
 0x266   :  { %468 = vmatprep.mubr.f32.mxu0 %v1697_v41  ;;  %557 = vmatprep.mubr.f32.mxu1 %v1697_v41 }
 0x269   :  { %1547 = vmatmul.mubr.msk.f32.gmra.mrb[8].mxu0 %vm379_vm1, %v371_v63  ;;  %1551 = vmatmul.mubr.msk.f32.gmra.mrb[8].mxu1 %vm379_vm1, %v371_v63 }
 0x26a   :  { %474 = vmatprep.mubr.f32.mxu0 %v1697_v41  ;;  %563 = vmatprep.mubr.f32.mxu1 %v1697_v41 }
 0x26d   :  { %1548 = vmatmul.mubr.msk.f32.gmra.mrb[10].mxu0 %vm379_vm1, %v376_v1  ;;  %1552 = vmatmul.mubr.msk.f32.gmra.mrb[10].mxu1 %vm379_vm1, %v376_v1 }
 0x26e   :  { %634 = vmatprep.mubr.f32.mxu0 %v1697_v41  ;;  %723 = vmatprep.mubr.f32.mxu1 %v1697_v41 }
 0x271   :  { %1553 = vmatmul.mubr.msk.f32.vlgmr.msra.gmra.mrb[12].mxu0 %vm379_vm1, %v361_v55  ;;  %1557 = vmatmul.mubr.msk.f32.vlgmr.msra.gmra.mrb[12].mxu1 %vm379_vm1, %v361_v55 }
 0x272   :  { %640 = vmatprep.mubr.f32.mxu0 %v1697_v41  ;;  %729 = vmatprep.mubr.f32.mxu1 %v1697_v41 }
 0x275   :  { %1554 = vmatmul.mubr.msk.f32.gmra.mrb[14].mxu0 %vm379_vm1, %v366_v61  ;;  %1558 = vmatmul.mubr.msk.f32.gmra.mrb[14].mxu1 %vm379_vm1, %v366_v61 }
 0x276   :  { %646 = vmatprep.mubr.f32.mxu0 %v1697_v41  ;;  %735 = vmatprep.mubr.f32.mxu1 %v1697_v41 }
 0x279   :  { %1555 = vmatmul.mubr.msk.f32.gmra.mrb[16].mxu0 %vm379_vm1, %v371_v63  ;;  %1559 = vmatmul.mubr.msk.f32.gmra.mrb[16].mxu1 %vm379_vm1, %v371_v63  ;;  %v827_v63 = vmul.f32 %v780_v13, %v1958_v28 }
 0x27a   :  { %652 = vmatprep.mubr.f32.mxu0 %v1697_v41  ;;  %741 = vmatprep.mubr.f32.mxu1 %v1697_v41 }
 0x27d   :  { %1556 = vmatmul.mubr.msk.f32.gmra.mrb[18].mxu0 %vm379_vm1, %v376_v1  ;;  %1560 = vmatmul.mubr.msk.f32.gmra.mrb[18].mxu1 %vm379_vm1, %v376_v1  ;;  %v826_v1 = vmul.f32 %v776_v14, %v1958_v28 }
 0x27e   :  { %1009 = vmatprep.mubr.f32.mxu0 %v1697_v41  ;;  %1098 = vmatprep.mubr.f32.mxu1 %v1697_v41 }
 0x334   :  { %v458_v17 = vpop.f32.mrb[4].mxu0  ;;  %v547_v18 = vpop.f32.mrb[4].mxu1 }
 0x335   :  { %v460_v21 = vpop.f32.mrb[5].mxu0  ;;  %v549_v22 = vpop.f32.mrb[5].mxu1  ;;  %v841_v29 = vadd.f32 %v809_v19, %v458_v17  ;;  %v843_v30 = vadd.f32 %v811_v20, %v547_v18  ;;  %v835_v17 = vmul.f32 %v780_v13, %v1973_v50  ;;  %v834_v18 = vmul.f32 %v776_v14, %v1973_v50 }
 0x336   :  { %v842_v33 = vadd.f32 %v810_v25, %v460_v21  ;;  %v844_v34 = vadd.f32 %v812_v26, %v549_v22 }
 0x337   :  { %v873_v51 = vmax.f32 %v841_v29, 0.0  ;;  %v875_v52 = vmax.f32 %v843_v30, 0.0  ;;  %v813_v30 = vmul.f32 %v1966_v44, %v1940_v11 }
 0x338   :  { %v464_v35 = vpop.f32.mrb[6].mxu0  ;;  %v553_v36 = vpop.f32.mrb[6].mxu1  ;;  %v874_v55 = vmax.f32 %v842_v33, 0.0  ;;  %v876_v56 = vmax.f32 %v844_v34, 0.0 }
 0x339   :  { %v849_v39 = vadd.f32 %v817_v31, %v464_v35  ;;  %v851_v40 = vadd.f32 %v819_v32, %v553_v36  ;;  %v466_v42 = vpop.f32.mrb[7].mxu0  ;;  %v555_v43 = vpop.f32.mrb[7].mxu1  ;;  %v1990_v31 = vrot.slane %v1934_v6, %v799_v49  ;;  %v814_v6 = vmul.f32 %v1985_v12, %v1940_v11 }
 0x33a   :  { %v850_v46 = vadd.f32 %v818_v37, %v466_v42  ;;  %v852_v47 = vadd.f32 %v820_v38, %v555_v43  ;;  %v815_v43 = vmul.f32 %v1969_v45, %v1940_v11 }
 0x33b   :  { %v881_v53 = vmax.f32 %v849_v39, 0.0  ;;  %v883_v54 = vmax.f32 %v851_v40, 0.0 }
 0x33c   :  { %v882_v57 = vmax.f32 %v850_v46, 0.0  ;;  %v884_v58 = vmax.f32 %v852_v47, 0.0  ;;  %v470_v59 = vpop.f32.mrb[8].mxu0  ;;  %v559_v60 = vpop.f32.mrb[8].mxu1 }
 0x33d   :  { %v1655_v61 = vpack.c.bf16 %v881_v53, %v873_v51  ;;  %v1663_v62 = vpack.c.bf16 %v883_v54, %v875_v52  ;;  %v472_v0 = vpop.f32.mrb[9].mxu0  ;;  %v561_v2 = vpop.f32.mrb[9].mxu1  ;;  %v857_v9 = vadd.f32 %v825_v48, %v470_v59  ;;  %v859_v10 = vadd.f32 %v827_v63, %v559_v60 }
 0x33e   :  { %v1653_v4 = vpack.c.bf16 %v882_v57, %v874_v55  ;;  %v1661_v5 = vpack.c.bf16 %v884_v58, %v876_v56  ;;  %v858_v19 = vadd.f32 %v826_v1, %v472_v0  ;;  %v860_v20 = vadd.f32 %v828_v7, %v561_v2  ;;  %v2009_v1 = vld [vmem:[%s2176_s2 + $0x40] sm:$0xff] }
 0x33f   :  { %v889_v32 = vmax.f32 %v857_v9, 0.0  ;;  %v891_v33 = vmax.f32 %v859_v10, 0.0  ;;  %v816_v51 = vmul.f32 %v1990_v31, %v1940_v11  ;;  %v821_v52 = vmul.f32 %v1966_v44, %v1948_v16 }
 0x340   :  { %v476_v21 = vpop.f32.mrb[10].mxu0  ;;  %v565_v22 = vpop.f32.mrb[10].mxu1  ;;  %1654 = vmatprep.subr.bf16.mxu0 %v1653_v4  ;;  %1662 = vmatprep.subr.bf16.mxu1 %v1661_v5  ;;  %v890_v35 = vmax.f32 %v858_v19, 0.0  ;;  %v892_v36 = vmax.f32 %v860_v20, 0.0  ;;  %v823_v55 = vmul.f32 %v1969_v45, %v1948_v16  ;;  %v822_v56 = vmul.f32 %v1985_v12, %v1948_v16 }
 0x341   :  { %v865_v24 = vadd.f32 %v833_v8, %v476_v21  ;;  %v867_v25 = vadd.f32 %v835_v17, %v565_v22  ;;  %v478_v26 = vpop.f32.mrb[11].mxu0  ;;  %v567_v29 = vpop.f32.mrb[11].mxu1  ;;  %1656 = vmatpush1.bf16.msra.mxu0 %v1655_v61  ;;  %1664 = vmatpush1.bf16.msra.mxu1 %v1663_v62  ;;  %v824_v11 = vmul.f32 %v1990_v31, %v1948_v16 }
 0x342   :  { %v866_v13 = vadd.f32 %v834_v18, %v478_v26  ;;  %v868_v14 = vadd.f32 %v836_v23, %v567_v29  ;;  %v829_v5 = vmul.f32 %v1966_v44, %v1958_v28  ;;  %v830_v26 = vmul.f32 %v1985_v12, %v1958_v28 }
 0x343   :  { %v897_v15 = vmax.f32 %v865_v24, 0.0  ;;  %v899_v34 = vmax.f32 %v867_v25, 0.0  ;;  %v831_v24 = vmul.f32 %v1969_v45, %v1958_v28 }
 0x344   :  { %v898_v37 = vmax.f32 %v866_v13, 0.0  ;;  %v900_v38 = vmax.f32 %v868_v14, 0.0  ;;  %v636_v39 = vpop.f32.mrb[12].mxu0  ;;  %v725_v40 = vpop.f32.mrb[12].mxu1  ;;  %v906_v13 = vld [vmem:[%s2176_s2 + $0x48] sm:$0xff] }
 0x345   :  { %v1659_v27 = vpack.c.bf16 %v897_v15, %v889_v32  ;;  %v1667_v42 = vpack.c.bf16 %v899_v34, %v891_v33  ;;  %v638_v46 = vpop.f32.mrb[13].mxu0  ;;  %v727_v47 = vpop.f32.mrb[13].mxu1  ;;  %v845_v53 = vadd.f32 %v813_v30, %v636_v39  ;;  %v847_v54 = vadd.f32 %v815_v43, %v725_v40 }
 0x346   :  { %v1657_v48 = vpack.c.bf16 %v898_v37, %v890_v35  ;;  %v1665_v49 = vpack.c.bf16 %v900_v38, %v892_v36  ;;  %v846_v57 = vadd.f32 %v814_v6, %v638_v46  ;;  %v848_v58 = vadd.f32 %v816_v51, %v727_v47 }
 0x347   :  { %v877_v7 = vmax.f32 %v845_v53, 0.0  ;;  %v879_v8 = vmax.f32 %v847_v54, 0.0  ;;  %v832_v32 = vmul.f32 %v1990_v31, %v1958_v28  ;;  %v837_v33 = vmul.f32 %v1966_v44, %v1973_v50 }
 0x348   :  { %v642_v59 = vpop.f32.mrb[14].mxu0  ;;  %v731_v60 = vpop.f32.mrb[14].mxu1  ;;  %1658 = vmatprep.subr.bf16.mxu0 %v1657_v48  ;;  %1666 = vmatprep.subr.bf16.mxu1 %v1665_v49  ;;  %v878_v10 = vmax.f32 %v846_v57, 0.0  ;;  %v880_v17 = vmax.f32 %v848_v58, 0.0  ;;  %v839_v35 = vmul.f32 %v1969_v45, %v1973_v50  ;;  %v838_v36 = vmul.f32 %v1985_v12, %v1973_v50  ;;  %v907_v12 = vld [vmem:[%s2176_s2 + $0x50] sm:$0xff] }
 0x349   :  { %v853_v61 = vadd.f32 %v821_v52, %v642_v59  ;;  %v855_v62 = vadd.f32 %v823_v55, %v731_v60  ;;  %v644_v63 = vpop.f32.mrb[15].mxu0  ;;  %v733_v0 = vpop.f32.mrb[15].mxu1  ;;  %1660 = vmatpush1.bf16.msra.mxu0 %v1659_v27  ;;  %1668 = vmatpush1.bf16.msra.mxu1 %v1667_v42  ;;  %v840_v28 = vmul.f32 %v1990_v31, %v1973_v50  ;;  %v908_v55 = vld [vmem:[%s2176_s2 + $0x58] sm:$0xff] }
 0x34a   :  { %v854_v2 = vadd.f32 %v822_v56, %v644_v63  ;;  %v856_v4 = vadd.f32 %v824_v11, %v733_v0  ;;  %v2070_v58 = vpop.permute.xlu0 %915  ;;  %v2072_v59 = vpop.permute.xlu1 %920 }
 0x34b   :  { %v885_v9 = vmax.f32 %v853_v61, 0.0  ;;  %v887_v16 = vmax.f32 %v855_v62, 0.0 }
 0x34c   :  { %v886_v18 = vmax.f32 %v854_v2, 0.0  ;;  %v888_v19 = vmax.f32 %v856_v4, 0.0  ;;  %v648_v20 = vpop.f32.mrb[16].mxu0  ;;  %v737_v21 = vpop.f32.mrb[16].mxu1  ;;  %1561 = vmatmul.mubr.msk.f32.vlgmr.msra.gmra.mrb[20].mxu0 %vm160_vm0, %v2009_v1  ;;  %1565 = vmatmul.mubr.msk.f32.vlgmr.msra.gmra.mrb[20].mxu1 %vm160_vm0, %v2009_v1 }
 0x34d   :  { %v1671_v22 = vpack.c.bf16 %v885_v9, %v877_v7  ;;  %v1679_v23 = vpack.c.bf16 %v887_v16, %v879_v8  ;;  %v650_v25 = vpop.f32.mrb[17].mxu0  ;;  %v739_v29 = vpop.f32.mrb[17].mxu1  ;;  %1015 = vmatprep.mubr.f32.mxu0 %v1697_v41  ;;  %1104 = vmatprep.mubr.f32.mxu1 %v1697_v41  ;;  %v861_v15 = vadd.f32 %v829_v5, %v648_v20  ;;  %v1698_v5 = vmov 1966171168  }
 0x34e   :  { %v1669_v14 = vpack.c.bf16 %v886_v18, %v878_v10  ;;  %v1677_v30 = vpack.c.bf16 %v888_v19, %v880_v17  ;;  %v863_v34 = vadd.f32 %v831_v24, %v737_v21  ;;  %v862_v37 = vadd.f32 %v830_v26, %v650_v25  ;;  %v2074_v60 = vpop.permute.xlu0 %925  ;;  %v2076_v11 = vpop.permute.xlu1 %930 }
 0x34f   :  { %v864_v38 = vadd.f32 %v832_v32, %v739_v29  ;;  %v893_v6 = vmax.f32 %v861_v15, 0.0  ;;  %v2082_v7 = vunpack.c.l.s4 %v1698_v5 }
 0x350   :  { %v654_v39 = vpop.f32.mrb[18].mxu0  ;;  %v743_v40 = vpop.f32.mrb[18].mxu1  ;;  %1562 = vmatmul.mubr.msk.f32.gmra.mrb[22].mxu0 %vm160_vm0, %v906_v13  ;;  %1566 = vmatmul.mubr.msk.f32.gmra.mrb[22].mxu1 %vm160_vm0, %v906_v13  ;;  %v895_v47 = vmax.f32 %v863_v34, 0.0  ;;  %v894_v50 = vmax.f32 %v862_v37, 0.0 }
 0x351   :  { %v869_v44 = vadd.f32 %v837_v33, %v654_v39  ;;  %v871_v27 = vadd.f32 %v839_v35, %v743_v40  ;;  %1670 = vmatprep.subr.bf16.mxu0 %v1669_v14  ;;  %1678 = vmatprep.subr.bf16.mxu1 %v1677_v30  ;;  %v656_v42 = vpop.f32.mrb[19].mxu0  ;;  %v745_v45 = vpop.f32.mrb[19].mxu1  ;;  %v896_v31 = vmax.f32 %v864_v38, 0.0  ;;  %v1488_v26 = vunpack.c.0.s8 %v2082_v7 }
 0x352   :  { %v870_v43 = vadd.f32 %v838_v36, %v656_v42  ;;  %v872_v46 = vadd.f32 %v840_v28, %v745_v45  ;;  %1672 = vmatpush1.bf16.msra.mxu0 %v1671_v22  ;;  %1680 = vmatpush1.bf16.msra.mxu1 %v1679_v23  ;;  %v2084_v8 = vpop.permute.xlu0 %1339  ;;  %v2091_v29 = vpop.permute.xlu1 %1344 }
 0x353   :  { %v901_v48 = vmax.f32 %v869_v44, 0.0  ;;  %v903_v49 = vmax.f32 %v871_v27, 0.0  ;;  %1021 = vmatprep.mubr.f32.mxu0 %v1697_v41  ;;  %1110 = vmatprep.mubr.f32.mxu1 %v1697_v41 }
 0x354   :  { %v902_v51 = vmax.f32 %v870_v43, 0.0  ;;  %v904_v52 = vmax.f32 %v872_v46, 0.0  ;;  %1563 = vmatmul.mubr.msk.f32.gmra.mrb[24].mxu0 %vm160_vm0, %v907_v12  ;;  %1567 = vmatmul.mubr.msk.f32.gmra.mrb[24].mxu1 %vm160_vm0, %v907_v12 }
 0x355   :  { %v1675_v53 = vpack.c.bf16 %v901_v48, %v893_v6  ;;  %v1683_v54 = vpack.c.bf16 %v903_v49, %v895_v47  ;;  %1027 = vmatprep.mubr.f32.mxu0 %v1697_v41  ;;  %1116 = vmatprep.mubr.f32.mxu1 %v1697_v41 }
 0x356   :  { %v1673_v56 = vpack.c.bf16 %v902_v51, %v894_v50  ;;  %v1681_v57 = vpack.c.bf16 %v904_v52, %v896_v31  ;;  %v2105_v46 = vpop.permute.xlu0 %1349 }
 0x358   :  { %1564 = vmatmul.mubr.msk.f32.gmra.mrb[26].mxu0 %vm160_vm0, %v908_v55  ;;  %1568 = vmatmul.mubr.msk.f32.gmra.mrb[26].mxu1 %vm160_vm0, %v908_v55 }
 0x359   :  { %1674 = vmatprep.subr.bf16.mxu0 %v1673_v56  ;;  %1682 = vmatprep.subr.bf16.mxu1 %v1681_v57 }
 0x35a   :  { %1676 = vmatpush1.bf16.msra.mxu0 %v1675_v53  ;;  %1684 = vmatpush1.bf16.msra.mxu1 %v1683_v54 }
 0x35b   :  { %1187 = vmatprep.mubr.f32.mxu0 %v1697_v41  ;;  %1276 = vmatprep.mubr.f32.mxu1 %v1697_v41 }
 0x35d   :  { %1569 = vmatmul.mubr.msk.f32.vlgmr.msra.gmra.mrb[28].mxu0 %vm160_vm0, %v2009_v1  ;;  %1573 = vmatmul.mubr.msk.f32.vlgmr.msra.gmra.mrb[28].mxu1 %vm160_vm0, %v2009_v1 }
 0x35e   :  { %1193 = vmatprep.mubr.f32.mxu0 %v1697_v41  ;;  %1282 = vmatprep.mubr.f32.mxu1 %v1697_v41 }
 0x361   :  { %1570 = vmatmul.mubr.msk.f32.gmra.mrb[30].mxu0 %vm160_vm0, %v906_v13  ;;  %1574 = vmatmul.mubr.msk.f32.gmra.mrb[30].mxu1 %vm160_vm0, %v906_v13 }
 0x362   :  { %1199 = vmatprep.mubr.f32.mxu0 %v1697_v41  ;;  %1288 = vmatprep.mubr.f32.mxu1 %v1697_v41 }
 0x365   :  { %1571 = vmatmul.mubr.msk.f32.gmra.mrb[32].mxu0 %vm160_vm0, %v907_v12  ;;  %1575 = vmatmul.mubr.msk.f32.gmra.mrb[32].mxu1 %vm160_vm0, %v907_v12 }
 0x366   :  { %1205 = vmatprep.mubr.f32.mxu0 %v1697_v41  ;;  %1294 = vmatprep.mubr.f32.mxu1 %v1697_v41 }
 0x369   :  { %1572 = vmatmul.mubr.msk.f32.gmra.mrb[34].mxu0 %vm160_vm0, %v908_v55  ;;  %1576 = vmatmul.mubr.msk.f32.gmra.mrb[34].mxu1 %vm160_vm0, %v908_v55 }
 0x41f   :  { %v1011_v61 = vpop.f32.mrb[20].mxu0  ;;  %v1100_v62 = vpop.f32.mrb[20].mxu1 }
 0x420   :  { %v1012_v63 = vadd.f32 %v1011_v61, %v2070_v58  ;;  %v1101_v0 = vadd.f32 %v1100_v62, %v2070_v58  ;;  %v1013_v1 = vpop.f32.mrb[21].mxu0  ;;  %v1102_v41 = vpop.f32.mrb[21].mxu1 }
 0x421   :  { %v1014_v2 = vadd.f32 %v1013_v1, %v2070_v58  ;;  %v1103_v4 = vadd.f32 %v1102_v41, %v2070_v58 }
 0x422   :  { %v1301_v9 = vmax.f32 %v1012_v63, 0.0  ;;  %v1303_v16 = vmax.f32 %v1101_v0, 0.0 }
 0x423   :  { %v1302_v10 = vmax.f32 %v1014_v2, 0.0  ;;  %v1304_v17 = vmax.f32 %v1103_v4, 0.0  ;;  %v1017_v18 = vpop.f32.mrb[22].mxu0  ;;  %v1106_v19 = vpop.f32.mrb[22].mxu1 }
 0x424   :  { %v1018_v20 = vadd.f32 %v1017_v18, %v2072_v59  ;;  %v1107_v21 = vadd.f32 %v1106_v19, %v2072_v59  ;;  %v1019_v22 = vpop.f32.mrb[23].mxu0  ;;  %v1108_v23 = vpop.f32.mrb[23].mxu1  ;;  %v1357_v13 = vmul.f32 %v2084_v8, %v1301_v9  ;;  %v1359_v14 = vmul.f32 %v2084_v8, %v1303_v16 }
 0x425   :  { %v1020_v24 = vadd.f32 %v1019_v22, %v2072_v59  ;;  %v1109_v25 = vadd.f32 %v1108_v23, %v2072_v59  ;;  %v1358_v33 = vmul.f32 %v2084_v8, %v1302_v10  ;;  %v1360_v15 = vmul.f32 %v2084_v8, %v1304_v17  ;;  %v2115_v16 = vpop.permute.xlu1 %1354 }
 0x426   :  { %v1309_v30 = vmax.f32 %v1018_v20, 0.0  ;;  %v1311_v32 = vmax.f32 %v1107_v21, 0.0  ;;  %v2120_v22 = vsub.s32 %v1488_v26, %v1926_v3 }
 0x427   :  { %v1310_v34 = vmax.f32 %v1020_v24, 0.0  ;;  %v1312_v35 = vmax.f32 %v1109_v25, 0.0  ;;  %v1023_v36 = vpop.f32.mrb[24].mxu0  ;;  %v1112_v37 = vpop.f32.mrb[24].mxu1 }
 0x428   :  { %v1365_v38 = vmul.f32 %v2091_v29, %v1309_v30  ;;  %v1367_v39 = vmul.f32 %v2091_v29, %v1311_v32  ;;  %v1024_v40 = vadd.f32 %v1023_v36, %v2074_v60  ;;  %v1113_v28 = vadd.f32 %v1112_v37, %v2074_v60  ;;  %v1025_v44 = vpop.f32.mrb[25].mxu0  ;;  %v1114_v27 = vpop.f32.mrb[25].mxu1 }
 0x429   :  { %v1366_v42 = vmul.f32 %v2091_v29, %v1310_v34  ;;  %v1368_v45 = vmul.f32 %v2091_v29, %v1312_v35  ;;  %v1026_v12 = vadd.f32 %v1025_v44, %v2074_v60  ;;  %v1115_v43 = vadd.f32 %v1114_v27, %v2074_v60 }
 0x42a   :  { %v1389_v6 = vadd.f32 %v1365_v38, %v1357_v13  ;;  %v1407_v47 = vadd.f32 %v1367_v39, %v1359_v14  ;;  %v1317_v48 = vmax.f32 %v1024_v40, 0.0  ;;  %v1319_v49 = vmax.f32 %v1113_v28, 0.0 }
 0x42b   :  { %v1398_v50 = vadd.f32 %v1366_v42, %v1358_v33  ;;  %v1416_v31 = vadd.f32 %v1368_v45, %v1360_v15  ;;  %v1318_v51 = vmax.f32 %v1026_v12, 0.0  ;;  %v1320_v52 = vmax.f32 %v1115_v43, 0.0  ;;  %v1029_v53 = vpop.f32.mrb[26].mxu0  ;;  %v1118_v54 = vpop.f32.mrb[26].mxu1 }
 0x42c   :  { %v1373_v55 = vmul.f32 %v2105_v46, %v1317_v48  ;;  %v1375_v56 = vmul.f32 %v2105_v46, %v1319_v49  ;;  %v1030_v57 = vadd.f32 %v1029_v53, %v2076_v11  ;;  %v1119_v61 = vadd.f32 %v1118_v54, %v2076_v11  ;;  %v1031_v62 = vpop.f32.mrb[27].mxu0  ;;  %v1120_v63 = vpop.f32.mrb[27].mxu1 }
 0x42d   :  { %v1374_v0 = vmul.f32 %v2105_v46, %v1318_v51  ;;  %v1376_v1 = vmul.f32 %v2105_v46, %v1320_v52  ;;  %v1032_v41 = vadd.f32 %v1031_v62, %v2076_v11  ;;  %v1121_v2 = vadd.f32 %v1120_v63, %v2076_v11 }
 0x42e   :  { %v1390_v4 = vadd.f32 %v1389_v6, %v1373_v55  ;;  %v1408_v5 = vadd.f32 %v1407_v47, %v1375_v56  ;;  %v1325_v7 = vmax.f32 %v1030_v57, 0.0  ;;  %v1327_v9 = vmax.f32 %v1119_v61, 0.0 }
 0x42f   :  { %v1399_v10 = vadd.f32 %v1398_v50, %v1374_v0  ;;  %v1417_v17 = vadd.f32 %v1416_v31, %v1376_v1  ;;  %v1326_v18 = vmax.f32 %v1032_v41, 0.0  ;;  %v1328_v19 = vmax.f32 %v1121_v2, 0.0 }
 0x430   :  { %v1381_v20 = vmul.f32 %v2115_v16, %v1325_v7  ;;  %v1383_v21 = vmul.f32 %v2115_v16, %v1327_v9  ;;  %v1189_v23 = vpop.f32.mrb[28].mxu0  ;;  %v1278_v24 = vpop.f32.mrb[28].mxu1 }
 0x431   :  { %v1382_v25 = vmul.f32 %v2115_v16, %v1326_v18  ;;  %v1384_v13 = vmul.f32 %v2115_v16, %v1328_v19  ;;  %v1190_v14 = vadd.f32 %v1189_v23, %v2070_v58  ;;  %v1279_v30 = vadd.f32 %v1278_v24, %v2070_v58  ;;  %v1191_v32 = vpop.f32.mrb[29].mxu0  ;;  %v1280_v33 = vpop.f32.mrb[29].mxu1 }
 0x432   :  { %v1391_v15 = vadd.f32 %v1390_v4, %v1381_v20  ;;  %v1409_v34 = vadd.f32 %v1408_v5, %v1383_v21  ;;  %v1192_v35 = vadd.f32 %v1191_v32, %v2070_v58  ;;  %v1281_v36 = vadd.f32 %v1280_v33, %v2070_v58 }
 0x433   :  { %v1400_v3 = vadd.f32 %v1399_v10, %v1382_v25  ;;  %v1418_v26 = vadd.f32 %v1417_v17, %v1384_v13  ;;  %v1305_v37 = vmax.f32 %v1190_v14, 0.0  ;;  %v1307_v38 = vmax.f32 %v1279_v30, 0.0 }
 0x434   :  { %v1392_v39 = vrot.slane %v1391_v15, 4  ;;  %v1410_v40 = vrot.slane %v1409_v34, 4  ;;  %v1306_v28 = vmax.f32 %v1192_v35, 0.0  ;;  %v1308_v44 = vmax.f32 %v1281_v36, 0.0  ;;  %v1195_v27 = vpop.f32.mrb[30].mxu0  ;;  %v1284_v42 = vpop.f32.mrb[30].mxu1 }
 0x435   :  { %v1401_v45 = vrot.slane %v1400_v3, 4  ;;  %v1419_v12 = vrot.slane %v1418_v26, 4  ;;  %v1361_v43 = vmul.f32 %v2084_v8, %v1305_v37  ;;  %v1363_v6 = vmul.f32 %v2084_v8, %v1307_v38  ;;  %v1197_v47 = vpop.f32.mrb[31].mxu0  ;;  %v1286_v48 = vpop.f32.mrb[31].mxu1 }
 0x436   :  { %v1393_v49 = vadd.f32 %v1392_v39, %v1391_v15  ;;  %v1411_v58 = vadd.f32 %v1410_v40, %v1409_v34  ;;  %v1362_v50 = vmul.f32 %v2084_v8, %v1306_v28  ;;  %v1364_v31 = vmul.f32 %v2084_v8, %v1308_v44  ;;  %v2140_v37 = vpop.permute.xlu0 %1463 }
 0x437   :  { %v1402_v51 = vadd.f32 %v1401_v45, %v1400_v3  ;;  %v1420_v52 = vadd.f32 %v1419_v12, %v1418_v26  ;;  %v1196_v53 = vadd.f32 %v1195_v27, %v2072_v59  ;;  %v1285_v54 = vadd.f32 %v1284_v42, %v2072_v59 }
 0x438   :  { %v1394_v55 = vrot.slane %v1393_v49, 2  ;;  %v1412_v56 = vrot.slane %v1411_v58, 2  ;;  %v1198_v57 = vadd.f32 %v1197_v47, %v2072_v59  ;;  %v1287_v61 = vadd.f32 %v1286_v48, %v2072_v59  ;;  %v1201_v62 = vpop.f32.mrb[32].mxu0  ;;  %v1290_v63 = vpop.f32.mrb[32].mxu1 }
 0x439   :  { %v1403_v0 = vrot.slane %v1402_v51, 2  ;;  %v1421_v1 = vrot.slane %v1420_v52, 2  ;;  %v1313_v41 = vmax.f32 %v1196_v53, 0.0  ;;  %v1315_v2 = vmax.f32 %v1285_v54, 0.0  ;;  %v1203_v4 = vpop.f32.mrb[33].mxu0  ;;  %v1292_v8 = vpop.f32.mrb[33].mxu1 }
 0x43a   :  { %v1395_v5 = vadd.f32 %v1394_v55, %v1393_v49  ;;  %v1413_v7 = vadd.f32 %v1412_v56, %v1411_v58  ;;  %v1314_v9 = vmax.f32 %v1198_v57, 0.0  ;;  %v1316_v10 = vmax.f32 %v1287_v61, 0.0 }
 0x43b   :  { %v1404_v17 = vadd.f32 %v1403_v0, %v1402_v51  ;;  %v1422_v18 = vadd.f32 %v1421_v1, %v1420_v52  ;;  %v1369_v19 = vmul.f32 %v2091_v29, %v1313_v41  ;;  %v1371_v20 = vmul.f32 %v2091_v29, %v1315_v2 }
 0x43c   :  { %v1396_v21 = vrot.slane %v1395_v5, 1  ;;  %v1414_v59 = vrot.slane %v1413_v7, 1  ;;  %v1370_v23 = vmul.f32 %v2091_v29, %v1314_v9  ;;  %v1372_v24 = vmul.f32 %v2091_v29, %v1316_v10  ;;  %v1207_v25 = vpop.f32.mrb[34].mxu0  ;;  %v1296_v13 = vpop.f32.mrb[34].mxu1 }
 0x43d   :  { %v1405_v14 = vrot.slane %v1404_v17, 1  ;;  %v1423_v30 = vrot.slane %v1422_v18, 1  ;;  %v1425_v32 = vadd.f32 %v1369_v19, %v1361_v43  ;;  %v1443_v33 = vadd.f32 %v1371_v20, %v1363_v6  ;;  %v1209_v15 = vpop.f32.mrb[35].mxu0  ;;  %v1298_v34 = vpop.f32.mrb[35].mxu1 }
 0x43e   :  { %v1397_v35 = vadd.f32 %v1396_v21, %v1395_v5  ;;  %v1415_v36 = vadd.f32 %v1414_v59, %v1413_v7  ;;  %v1434_v3 = vadd.f32 %v1370_v23, %v1362_v50  ;;  %v1452_v26 = vadd.f32 %v1372_v24, %v1364_v31 }
 0x43f   :  { %v1406_v38 = vadd.f32 %v1405_v14, %v1404_v17  ;;  %v1424_v39 = vadd.f32 %v1423_v30, %v1422_v18  ;;  %v1202_v40 = vadd.f32 %v1201_v62, %v2074_v60  ;;  %v1291_v29 = vadd.f32 %v1290_v63, %v2074_v60 }
 0x440   :  { %v1466_v28 = vadd.f32 %v2140_v37, %v1397_v35  ;;  %v1468_v44 = vadd.f32 %v2140_v37, %v1415_v36  ;;  %v1204_v27 = vadd.f32 %v1203_v4, %v2074_v60  ;;  %v1293_v42 = vadd.f32 %v1292_v8, %v2074_v60 }
 0x441   :  { %v1467_v45 = vadd.f32 %v2140_v37, %v1406_v38  ;;  %v1469_v12 = vadd.f32 %v2140_v37, %v1424_v39  ;;  %v1321_v43 = vmax.f32 %v1202_v40, 0.0  ;;  %v1323_v6 = vmax.f32 %v1291_v29, 0.0 }
 0x442   :  { %v1322_v47 = vmax.f32 %v1204_v27, 0.0  ;;  %v1324_v48 = vmax.f32 %v1293_v42, 0.0  ;;  %v1208_v49 = vadd.f32 %v1207_v25, %v2076_v11  ;;  %v1297_v58 = vadd.f32 %v1296_v13, %v2076_v11 }
 0x443   :  { %v1482_v50 = vcombine.low %v1466_v28, %v1467_v45  ;;  %v1483_v31 = vcombine.low %v1468_v44, %v1469_v12  ;;  %v1377_v51 = vmul.f32 %v2105_v46, %v1321_v43  ;;  %v1379_v52 = vmul.f32 %v2105_v46, %v1323_v6 }
 0x444   :  { %v1378_v60 = vmul.f32 %v2105_v46, %v1322_v47  ;;  %v1380_v53 = vmul.f32 %v2105_v46, %v1324_v48  ;;  %v1329_v54 = vmax.f32 %v1208_v49, 0.0  ;;  %v1331_v55 = vmax.f32 %v1297_v58, 0.0 }
 0x445   :  { %v1492_v56 = vrot.slane %v1482_v50, %v2120_v22  ;;  %v1499_v57 = vrot.slane %v1483_v31, %v2120_v22  ;;  %v1426_v61 = vadd.f32 %v1425_v32, %v1377_v51  ;;  %v1444_v62 = vadd.f32 %v1443_v33, %v1379_v52 }
 0x446   :  { %v1435_v63 = vadd.f32 %v1434_v3, %v1378_v60  ;;  %v1453_v0 = vadd.f32 %v1452_v26, %v1380_v53  ;;  %v1385_v1 = vmul.f32 %v2115_v16, %v1329_v54  ;;  %v1387_v41 = vmul.f32 %v2115_v16, %v1331_v55 }
 0x447   :  { %v1514_v2 = vcombine.low %v1492_v56, %v1499_v57  ;;  %v1210_v4 = vadd.f32 %v1209_v15, %v2076_v11  ;;  %v1299_v8 = vadd.f32 %v1298_v34, %v2076_v11 }
 0x448   :  { %v1427_v46 = vadd.f32 %v1426_v61, %v1385_v1  ;;  %v1445_v5 = vadd.f32 %v1444_v62, %v1387_v41 }
 0x449   :  { %v1330_v7 = vmax.f32 %v1210_v4, 0.0  ;;  %v1332_v9 = vmax.f32 %v1299_v8, 0.0  ;;  %v1522_v49 = vrot.slane %v1514_v2, %v2120_v22 }
 0x44a   :  { %v1428_v10 = vrot.slane %v1427_v46, 4  ;;  %v1446_v17 = vrot.slane %v1445_v5, 4 }
 0x44b   :  { %v1386_v18 = vmul.f32 %v2115_v16, %v1330_v7  ;;  %v1388_v19 = vmul.f32 %v2115_v16, %v1332_v9 }
 0x44c   :  { %v1429_v20 = vadd.f32 %v1428_v10, %v1427_v46  ;;  %v1447_v21 = vadd.f32 %v1446_v17, %v1445_v5 }
 0x44d   :  { %v1436_v59 = vadd.f32 %v1435_v63, %v1386_v18  ;;  %v1454_v23 = vadd.f32 %v1453_v0, %v1388_v19 }
 0x44e   :  { %v1430_v24 = vrot.slane %v1429_v20, 2  ;;  %v1448_v25 = vrot.slane %v1447_v21, 2 }
 0x44f   :  { %v1437_v13 = vrot.slane %v1436_v59, 4  ;;  %v1455_v14 = vrot.slane %v1454_v23, 4 }
 0x450   :  { %v1431_v30 = vadd.f32 %v1430_v24, %v1429_v20  ;;  %v1449_v11 = vadd.f32 %v1448_v25, %v1447_v21 }
 0x451   :  { %v1438_v32 = vadd.f32 %v1437_v13, %v1436_v59  ;;  %v1456_v33 = vadd.f32 %v1455_v14, %v1454_v23 }
 0x452   :  { %v1432_v15 = vrot.slane %v1431_v30, 1  ;;  %v1450_v34 = vrot.slane %v1449_v11, 1 }
 0x453   :  { %v1439_v35 = vrot.slane %v1438_v32, 2  ;;  %v1457_v36 = vrot.slane %v1456_v33, 2 }
 0x454   :  { %v1433_v3 = vadd.f32 %v1432_v15, %v1431_v30  ;;  %v1451_v26 = vadd.f32 %v1450_v34, %v1449_v11 }
 0x455   :  { %v1440_v38 = vadd.f32 %v1439_v35, %v1438_v32  ;;  %v1458_v16 = vadd.f32 %v1457_v36, %v1456_v33 }
 0x456   :  { %v1470_v29 = vadd.f32 %v2140_v37, %v1433_v3  ;;  %v1472_v28 = vadd.f32 %v2140_v37, %v1451_v26 }
 0x457   :  { %v1441_v39 = vrot.slane %v1440_v38, 1  ;;  %v1459_v40 = vrot.slane %v1458_v16, 1 }
 0x459   :  { %v1442_v44 = vadd.f32 %v1441_v39, %v1440_v38  ;;  %v1460_v27 = vadd.f32 %v1459_v40, %v1458_v16 }
 0x45b   :  { %v1471_v42 = vadd.f32 %v2140_v37, %v1442_v44  ;;  %v1473_v45 = vadd.f32 %v2140_v37, %v1460_v27 }
 0x45d   :  { %v1484_v12 = vcombine.low %v1470_v29, %v1471_v42  ;;  %v1485_v43 = vcombine.low %v1472_v28, %v1473_v45 }
 0x45f   :  { %v1506_v6 = vrot.slane %v1484_v12, %v2120_v22  ;;  %v1513_v47 = vrot.slane %v1485_v43, %v2120_v22 }
 0x461   :  { %v1515_v48 = vcombine.low %v1506_v6, %v1513_v47 }
 0x463   :  { %v1529_v58 = vrot.slane %v1515_v48, %v2120_v22 }
 0x465   :  { %v1530_v50 = vcombine.low %v1522_v49, %v1529_v58 }
 0x467   :  { %1532 = vst [vmem:[%s2178_s3] sm:$0xff] %v1530_v50 }

</bundles_post_ra>
